<compile_context>
chip_gen: v6e
topology: v6e:2x2x1
jax: 0.10.0
libtpu: 0.0.40
codegen_flags: <defaults>
</compile_context>

<pallas_src>
import functools

import jax
import jax.numpy as jnp
from jax.experimental import pallas as pl
from jax.experimental.pallas import tpu as pltpu


def _round_up(x: int, m: int) -> int:
    return (x + m - 1) // m * m


def _decoder_kernel(z_ref, w1_ref, b1_ref, w2_ref, b2_ref, x_ref, *, approx_sigmoid):
    w_dtype = w1_ref.dtype
    z = z_ref[...].astype(w_dtype)
    # MXU matmul 1 (f32 accumulation) + bias + ReLU (VPU, f32).
    h = jnp.dot(z, w1_ref[...], preferred_element_type=jnp.float32) + b1_ref[...]
    h = jnp.maximum(h, 0.0)
    # MXU matmul 2 (f32 accumulation) + bias.
    logits = (
        jnp.dot(h.astype(w_dtype), w2_ref[...], preferred_element_type=jnp.float32)
        + b2_ref[...]
    )
    if approx_sigmoid:
        # exp and reciprocal both land on the (otherwise idle) EUP slot.
        x = pl.reciprocal(1.0 + jnp.exp(-logits), approx=True)
    else:
        x = jax.nn.sigmoid(logits)
    x_ref[...] = x.astype(x_ref.dtype)


def prepare_decoder_params(w1, b1, w2, b2, dtype=jnp.float32):
    """One-time layout prep (call OUTSIDE the hot loop).

    w1: (dim_h, dim_z), b1: (dim_h,), w2: (dim_x, dim_h), b2: (dim_x,)
    (PyTorch nn.Linear layout).  Weights are transposed to (in, out); only the
    OUTPUT feature dims (dim_h, dim_x) are zero-padded to multiples of 128 so
    stores / second-matmul operands are lane-dense.  The contraction dim dim_z
    is left unpadded so z needs no wrapper-side pad copy.  `dtype` controls the
    weight / matmul-input dtype (bf16 recommended on v6e/v7x); biases stay f32
    since the accumulator is f32.
    """
    dim_h, dim_z = w1.shape
    dim_x = w2.shape[0]
    hp, xp = _round_up(dim_h, 128), _round_up(dim_x, 128)

    w1_t = jnp.zeros((dim_z, hp), dtype).at[:, :dim_h].set(w1.T.astype(dtype))
    b1_p = jnp.zeros((1, hp), jnp.float32).at[:, :dim_h].set(b1.astype(jnp.float32))
    w2_t = jnp.zeros((hp, xp), dtype).at[:dim_h, :dim_x].set(w2.T.astype(dtype))
    b2_p = jnp.zeros((1, xp), jnp.float32).at[:, :dim_x].set(b2.astype(jnp.float32))

    return {"w1_t": w1_t, "b1": b1_p, "w2_t": w2_t, "b2": b2_p,
            "dim_z": dim_z, "dim_x": dim_x}


def _choose_batch_tile(B, dim_z, hp, xp, w_bytes, z_bytes, out_bytes):
    """Pick the batch tile + a VMEM limit derived from the actual footprint."""
    TB = min(512, _round_up(B, 8))
    if B > 8:
        # Guarantee >= 2 grid steps so v7x's two TensorCores both get work.
        TB = min(TB, _round_up(-(-B // 2), 8))

    # Resident weights/biases (x2 for pipeline buffering headroom).
    weight_bytes = 2 * (dim_z * hp + hp * xp) * w_bytes + 2 * (hp + xp) * 4

    def act_bytes(tb):
        # double-buffered z and out tiles + f32 (TB, hp) intermediate.
        return 2 * tb * dim_z * z_bytes + 2 * tb * xp * out_bytes + tb * hp * 4

    budget = 48 << 20  # safe on every generation (v7x has 64 MiB physical)
    while TB > 8 and weight_bytes + act_bytes(TB) > budget:
        TB = max(8, _round_up(TB // 2, 8))

    vmem_limit = int(min(max(weight_bytes + act_bytes(TB) + (8 << 20), 32 << 20),
                         112 << 20))
    return TB, vmem_limit


@functools.partial(jax.jit, static_argnames=("dim_x", "out_dtype", "approx_sigmoid"))
def _decoder_forward(z, w1_t, b1, w2_t, b2, *, dim_x, out_dtype, approx_sigmoid):
    B, dim_z = z.shape
    hp = w1_t.shape[1]
    xp = w2_t.shape[1]
    out_dtype = jnp.dtype(out_dtype)

    TB, vmem_limit = _choose_batch_tile(
        B, dim_z, hp, xp,
        w_bytes=jnp.dtype(w1_t.dtype).itemsize,
        z_bytes=jnp.dtype(z.dtype).itemsize,
        out_bytes=out_dtype.itemsize)

    grid = (pl.cdiv(B, TB),)
    kernel = functools.partial(_decoder_kernel, approx_sigmoid=approx_sigmoid)

    out = pl.pallas_call(
        kernel,
        out_shape=jax.ShapeDtypeStruct((B, xp), out_dtype),
        grid_spec=pltpu.PrefetchScalarGridSpec(
            num_scalar_prefetch=0,
            grid=grid,
            in_specs=[
                pl.BlockSpec((TB, dim_z), lambda i: (i, 0)),   # batch-tiled z (unpadded K)
                pl.BlockSpec((dim_z, hp), lambda i: (0, 0)),   # W1 resident
                pl.BlockSpec((1, hp), lambda i: (0, 0)),       # b1 resident
                pl.BlockSpec((hp, xp), lambda i: (0, 0)),      # W2 resident
                pl.BlockSpec((1, xp), lambda i: (0, 0)),       # b2 resident
            ],
            out_specs=pl.BlockSpec((TB, xp), lambda i: (i, 0)),
        ),
        compiler_params=pltpu.CompilerParams(
            dimension_semantics=("parallel",),   # batch tiles independent -> megacore
            vmem_limit_bytes=vmem_limit,
        ),
    )(z, w1_t, b1, w2_t, b2)

    # Padded lane columns are sigmoid(0); slice only when padding was added.
    if xp == dim_x:
        return out
    return out[:, :dim_x]


def decoder_forward(z, params, out_dtype=None, approx_sigmoid=False):
    """z: (B, dim_z) with dim_z == params['dim_z']; returns (B, dim_x)."""
    if out_dtype is None:
        out_dtype = z.dtype
    return _decoder_forward(
        z, params["w1_t"], params["b1"], params["w2_t"], params["b2"],
        dim_x=params["dim_x"], out_dtype=jnp.dtype(out_dtype),
        approx_sigmoid=bool(approx_sigmoid),
    )


def init_decoder_params(key, dim_z, dim_h, dim_x, dtype=jnp.float32):
    """Deterministic init mirroring nn.Linear's default U(-1/sqrt(fan_in), +)."""
    k1, k2, k3, k4 = jax.random.split(key, 4)
    bound1 = 1.0 / (dim_z ** 0.5)
    bound2 = 1.0 / (dim_h ** 0.5)
    w1 = jax.random.uniform(k1, (dim_h, dim_z), dtype, -bound1, bound1)
    b1 = jax.random.uniform(k2, (dim_h,), dtype, -bound1, bound1)
    w2 = jax.random.uniform(k3, (dim_x, dim_h), dtype, -bound2, bound2)
    b2 = jax.random.uniform(k4, (dim_x,), dtype, -bound2, bound2)
    return w1, b1, w2, b2


if __name__ == "__main__":
    dim_z, dim_h, dim_x = 16, 32, 64
    batch = 8

    key = jax.random.PRNGKey(0)
    key_z, key_p = jax.random.split(key)

    z = jax.random.normal(key_z, (batch, dim_z), dtype=jnp.float32)
    w1, b1, w2, b2 = init_decoder_params(key_p, dim_z, dim_h, dim_x)

    # One-time layout prep (transpose + lane-dense output padding), outside jit.
    # On v6e/v7x pass dtype=jnp.bfloat16 here (and relax the tolerance below).
    params = prepare_decoder_params(w1, b1, w2, b2, dtype=jnp.float32)

    x = decoder_forward(z, params)
    jax.block_until_ready(x)

    # Pure-JAX reference (same math as the PyTorch module).
    h_ref = jnp.maximum(z @ w1.T + b1, 0.0)
    x_ref = jax.nn.sigmoid(h_ref @ w2.T + b2)
    assert x.shape == (batch, dim_x)
    assert jnp.allclose(x, x_ref, atol=1e-5, rtol=1e-5)

    print("KERNEL_OK")
</pallas_src>

<mosaic_0001>
module attributes {stable_mosaic.version = 11 : i64} {
  func.func @_decoder_kernel(%arg0: i32, %arg1: memref<8x16xf32, #tpu.memory_space<vmem>>, %arg2: memref<16x128xf32, #tpu.memory_space<vmem>>, %arg3: memref<1x128xf32, #tpu.memory_space<vmem>>, %arg4: memref<128x128xf32, #tpu.memory_space<vmem>>, %arg5: memref<1x128xf32, #tpu.memory_space<vmem>>, %arg6: memref<8x128xf32, #tpu.memory_space<vmem>>) attributes {dimension_semantics = [#tpu.dimension_semantics<parallel>], iteration_bounds = array<i64: 1>, scalar_prefetch = 0 : i64, scratch_operands = 0 : i64, tpu.core_type = #tpu.core_type<tc>, window_params = [{transform_indices = @transform_0, window_bounds = array<i64: 8, 16>}, {pipeline_mode = #tpu.pipeline_mode<synchronous>, transform_indices = @transform_1, window_bounds = array<i64: 16, 128>}, {pipeline_mode = #tpu.pipeline_mode<synchronous>, transform_indices = @transform_2, window_bounds = array<i64: 1, 128>}, {pipeline_mode = #tpu.pipeline_mode<synchronous>, transform_indices = @transform_3, window_bounds = array<i64: 128, 128>}, {pipeline_mode = #tpu.pipeline_mode<synchronous>, transform_indices = @transform_4, window_bounds = array<i64: 1, 128>}, {transform_indices = @transform_5, window_bounds = array<i64: 8, 128>}]} {
    %c0 = arith.constant 0 : index
    %c0_0 = arith.constant 0 : index
    %0 = vector.load %arg1[%c0, %c0_0] : memref<8x16xf32, #tpu.memory_space<vmem>>, vector<8x16xf32>
    %c0_1 = arith.constant 0 : index
    %c0_2 = arith.constant 0 : index
    %1 = vector.load %arg2[%c0_1, %c0_2] : memref<16x128xf32, #tpu.memory_space<vmem>>, vector<16x128xf32>
    %cst = arith.constant dense<0.000000e+00> : vector<8x128xf32>
    %2 = tpu.matmul %0, %1, %cst {dimension_numbers = #tpu.dot_dimension_numbers<[1], [0], [0], [1], [0, 0, 1, 1], [], []>} : vector<8x16xf32>, vector<16x128xf32>, vector<8x128xf32> -> vector<8x128xf32>
    %c0_3 = arith.constant 0 : index
    %c0_4 = arith.constant 0 : index
    %3 = vector.load %arg3[%c0_3, %c0_4] : memref<1x128xf32, #tpu.memory_space<vmem>>, vector<1x128xf32>
    %4 = vector.broadcast %3 : vector<1x128xf32> to vector<8x128xf32>
    %5 = arith.addf %2, %4 : vector<8x128xf32>
    %cst_5 = arith.constant 0.000000e+00 : f32
    %6 = vector.broadcast %cst_5 : f32 to vector<8x128xf32>
    %7 = arith.maximumf %5, %6 : vector<8x128xf32>
    %c0_6 = arith.constant 0 : index
    %c0_7 = arith.constant 0 : index
    %8 = vector.load %arg4[%c0_6, %c0_7] : memref<128x128xf32, #tpu.memory_space<vmem>>, vector<128x128xf32>
    %cst_8 = arith.constant dense<0.000000e+00> : vector<8x128xf32>
    %9 = tpu.matmul %7, %8, %cst_8 {dimension_numbers = #tpu.dot_dimension_numbers<[1], [0], [0], [1], [0, 0, 1, 1], [], []>} : vector<8x128xf32>, vector<128x128xf32>, vector<8x128xf32> -> vector<8x128xf32>
    %c0_9 = arith.constant 0 : index
    %c0_10 = arith.constant 0 : index
    %10 = vector.load %arg5[%c0_9, %c0_10] : memref<1x128xf32, #tpu.memory_space<vmem>>, vector<1x128xf32>
    %11 = vector.broadcast %10 : vector<1x128xf32> to vector<8x128xf32>
    %12 = arith.addf %9, %11 : vector<8x128xf32>
    %13 = arith.negf %12 : vector<8x128xf32>
    %14 = math.exp %13 : vector<8x128xf32>
    %cst_11 = arith.constant 1.000000e+00 : f32
    %15 = vector.broadcast %cst_11 : f32 to vector<8x128xf32>
    %16 = arith.addf %15, %14 : vector<8x128xf32>
    %17 = arith.divf %15, %16 : vector<8x128xf32>
    %c0_12 = arith.constant 0 : index
    %c0_13 = arith.constant 0 : index
    %18 = vector.load %arg6[%c0_12, %c0_13] : memref<8x128xf32, #tpu.memory_space<vmem>>, vector<8x128xf32>
    tpu.vector_store %arg6[%c0_12, %c0_13], %17 {strides = array<i32>} : memref<8x128xf32, #tpu.memory_space<vmem>>, vector<8x128xf32>,
    return
  }
  func.func @transform_0(%arg0: i32) -> (i32, i32) {
    %c0_i32 = arith.constant 0 : i32
    %c0_i32_0 = arith.constant 0 : i32
    return %arg0, %c0_i32 : i32, i32
  }
  func.func @transform_1(%arg0: i32) -> (i32, i32) {
    %c0_i32 = arith.constant 0 : i32
    %c0_i32_0 = arith.constant 0 : i32
    %c0_i32_1 = arith.constant 0 : i32
    return %c0_i32, %c0_i32_0 : i32, i32
  }
  func.func @transform_2(%arg0: i32) -> (i32, i32) {
    %c0_i32 = arith.constant 0 : i32
    %c0_i32_0 = arith.constant 0 : i32
    %c0_i32_1 = arith.constant 0 : i32
    return %c0_i32, %c0_i32_0 : i32, i32
  }
  func.func @transform_3(%arg0: i32) -> (i32, i32) {
    %c0_i32 = arith.constant 0 : i32
    %c0_i32_0 = arith.constant 0 : i32
    %c0_i32_1 = arith.constant 0 : i32
    return %c0_i32, %c0_i32_0 : i32, i32
  }
  func.func @transform_4(%arg0: i32) -> (i32, i32) {
    %c0_i32 = arith.constant 0 : i32
    %c0_i32_0 = arith.constant 0 : i32
    %c0_i32_1 = arith.constant 0 : i32
    return %c0_i32, %c0_i32_0 : i32, i32
  }
  func.func @transform_5(%arg0: i32) -> (i32, i32) {
    %c0_i32 = arith.constant 0 : i32
    %c0_i32_0 = arith.constant 0 : i32
    return %arg0, %c0_i32 : i32, i32
  }
}

</mosaic_0001>

<bundles_post_ra>
// kernel: _decoder_forward.1
= control target key start
LH: loop header
LB: loop body
LE: loop exit
PB: predicated region body
PF: predicated region fallthrough
CT: control target
= control target key end

     0   :  { %10 = vsyncpa [#allocation3], 0  ;;  %s481_s0 = inlined_call_operand.hbm [shape: f32[8,16], index: 0, kind: input, shape index: {}]   ;;  %s482_s1 = inlined_call_operand.hbm [shape: f32[16,128], index: 1, kind: input, shape index: {}]   ;;  %s483_s2 = inlined_call_operand.vmem [shape: f32[1,128], index: 2, kind: input, shape index: {}]   ;;  %s484_s3 = inlined_call_operand.hbm [shape: f32[128,128], index: 3, kind: input, shape index: {}]   ;;  %s485_s4 = inlined_call_operand.vmem [shape: f32[1,128], index: 4, kind: input, shape index: {}]   ;;  %s486_s5 = inlined_call_operand.hbm [shape: f32[8,128], index: 5, kind: output, shape index: {}]  }
   0x1   :  { %11 = vsyncpa [#allocation6], 0 }
   0x2   :  { %12 = vsyncpa [#allocation4], 0  ;;  %s425_s18 = smov [#allocation5]  }
   0x3   :  { %s28_s19 = sshll.u32 %s425_s18, 4  ;;  %s29_s19 = int_to_ptr.vmem [resolvable:$true] %s28_s19 }
   0x4   :  { %s347_s20 = scalar_lea.vmem %s29_s19, 256  ;;  %p352_p1 = scmp.lt.s32.totalorder %s29_s19, %s29_s19 }
   0x5   :  { %p348_p0 = scmp.ne.s32.totalorder %s29_s19, %s347_s20  ;;  %p353_p2 = scmp.lt.s32.totalorder %s347_s20, %s347_s20 }
   0x7   :  { %p354_p3 = por %p353_p2, %p352_p1 }
   0x9   :  { %p355_p4 = pnand %p354_p3, %p348_p0 }
   0xb   :  { %358 = shalt.err (!%p355_p4)
}
   0xc   :  { %s426_s21 = smov 128   ;;  %s427_s22 = smov 8  }
   0xd   :  { %34 = dma.hbm_to_vmem [thread:$0]  %s482_s1, 256, %s29_s19, [#allocation6], %s426_s21, %s426_s21, %s427_s22  }
   0xe   :  { %s428_s25 = smov [#allocation2]   ;;  %s429_s27 = smov [#allocation7]  }
   0xf   :  { %s19_s26 = sshll.u32 %s428_s25, 4  ;;  %s42_s28 = sshll.u32 %s429_s27, 4  ;;  %s20_s26 = int_to_ptr.vmem [resolvable:$true] %s19_s26  ;;  %s43_s28 = int_to_ptr.vmem [resolvable:$true] %s42_s28 }
  0x10   :  { %s367_s29 = scalar_lea.vmem %s20_s26, 128  ;;  %p372_p6 = scmp.lt.s32.totalorder %s20_s26, %s20_s26 }
  0x11   :  { %p368_p5 = scmp.ne.s32.totalorder %s20_s26, %s367_s29  ;;  %p373_p7 = scmp.lt.s32.totalorder %s367_s29, %s367_s29 }
  0x13   :  { %p374_p8 = por %p373_p7, %p372_p6 }
  0x15   :  { %p375_p9 = pnand %p374_p8, %p368_p5 }
  0x17   :  { %378 = shalt.err (!%p375_p9)
}
  0x18   :  { %22 = dma.hbm_to_vmem [thread:$0]  %s481_s0, 128, %s20_s26, [#allocation3]  }
  0x19   :  { %s387_s7 = scalar_lea.vmem %s43_s28, 2048  ;;  %p392_p11 = scmp.lt.s32.totalorder %s43_s28, %s43_s28 }
  0x1a   :  { %p388_p10 = scmp.ne.s32.totalorder %s43_s28, %s387_s7  ;;  %p393_p12 = scmp.lt.s32.totalorder %s387_s7, %s387_s7 }
  0x1c   :  { %p394_p13 = por %p393_p12, %p392_p11 }
  0x1e   :  { %p395_p0 = pnand %p394_p13, %p388_p10 }
  0x20   :  { %398 = shalt.err (!%p395_p0)
}
  0x21   :  { %48 = dma.hbm_to_vmem [thread:$0]  %s484_s3, 2048, %s43_s28, [#allocation6], %s426_s21, %s426_s21, %s427_s22  }
  0x22   :  { %419 = dma.done.wait [#allocation3], 128  }
  0x23   :  { %420 = vsyncadd [#allocation3], 4294967168 }
  0x24   :  { %421 = dma.done.wait [#allocation6], 2304  }
  0x25   :  { %422 = vsyncadd [#allocation6], 4294964992  ;;  %v430_v0 = vmov 0.0   ;;  %vm431_vm0 = vmmov 0   ;;  %v62_v1 = vld [vmem:[#allocation5 + $0x8] sm:$0xff]  ;;  %v61_v2 = vld [vmem:[#allocation5] sm:$0xff] }
  0x26   :  { %285 = vmatprep.subr.mxu0 %v430_v0  ;;  %289 = vmatprep.mubr.msk.f32.mxu0 %vm431_vm0, %v430_v0  ;;  %v60_v3 = vld [vmem:[#allocation2] sm:$0xff]  ;;  %vm70_vm1 = vcmask 130048   ;;  %v160_v4 = vld [vmem:[#allocation7 + $0x78] sm:$0xff]  ;;  %v159_v5 = vld [vmem:[#allocation7 + $0x70] sm:$0xff]  ;;  %s432_s11 = smov [#allocation8]  }
  0x27   :  { %292 = vmatprep.subr.mxu1 %v430_v0  ;;  %324 = vmatprep.mubr.msk.f32.mxu1 %vm431_vm0, %v430_v0  ;;  %v158_v6 = vld [vmem:[#allocation7 + $0x68] sm:$0xff]  ;;  %v157_v7 = vld [vmem:[#allocation7 + $0x60] sm:$0xff]  ;;  %v156_v8 = vld [vmem:[#allocation7 + $0x58] sm:$0xff]  ;;  %s251_s12 = sshll.u32 %s432_s11, 4  ;;  %s252_s12 = int_to_ptr.vmem [resolvable:$true] %s251_s12 }
  0x28   :  { %286 = vmatpush3.msra.mxu0 %v62_v1  ;;  %293 = vmatpush3.msra.mxu1 %v160_v4  ;;  %v155_v9 = vld [vmem:[#allocation7 + $0x50] sm:$0xff]  ;;  %v154_v10 = vld [vmem:[#allocation7 + $0x48] sm:$0xff]  ;;  %v153_v11 = vld [vmem:[#allocation7 + $0x40] sm:$0xff]  ;;  %p404_p2 = scmp.lt.s32.totalorder %s252_s12, %s252_s12 }
  0x29   :  { %287 = vmatprep.subr.mxu0 %v430_v0  ;;  %294 = vmatprep.subr.mxu1 %v430_v0  ;;  %v152_v12 = vld [vmem:[#allocation7 + $0x38] sm:$0xff]  ;;  %v151_v13 = vld [vmem:[#allocation7 + $0x30] sm:$0xff]  ;;  %v150_v14 = vld [vmem:[#allocation7 + $0x28] sm:$0xff] }
  0x2a   :  { %288 = vmatpush3.msra.mxu0 %v61_v2  ;;  %295 = vmatpush3.msra.mxu1 %v159_v5  ;;  %v149_v15 = vld [vmem:[#allocation7 + $0x20] sm:$0xff]  ;;  %v148_v16 = vld [vmem:[#allocation7 + $0x18] sm:$0xff]  ;;  %v147_v17 = vld [vmem:[#allocation7 + $0x10] sm:$0xff] }
  0x2b   :  { %290 = vmatmul.mubr.msk.f32.vlgmr.msra.gmra.mxu0 %vm70_vm1, %v60_v3  ;;  %296 = vmatprep.subr.mxu1 %v430_v0  ;;  %v146_v18 = vld [vmem:[#allocation7 + $0x8] sm:$0xff]  ;;  %v145_v19 = vld [vmem:[#allocation7] sm:$0xff] }
  0x2c   :  { %297 = vmatpush3.msra.mxu1 %v158_v6  ;;  %v261_v20 = vld [vmem:[%s483_s2] ss:$0 sm:$0xff]  ;;  %s399_s2 = scalar_lea.vmem %s252_s12, 128 }
  0x2d   :  { %298 = vmatprep.subr.mxu1 %v430_v0  ;;  %v263_v25 = vld [vmem:[%s485_s4] ss:$0 sm:$0xff]  ;;  %p400_p1 = scmp.ne.s32.totalorder %s252_s12, %s399_s2  ;;  %p405_p3 = scmp.lt.s32.totalorder %s399_s2, %s399_s2 }
  0x2e   :  { %299 = vmatpush3.msra.mxu1 %v157_v7 }
  0x2f   :  { %300 = vmatprep.subr.mxu1 %v430_v0  ;;  %p406_p4 = por %p405_p3, %p404_p2 }
  0x30   :  { %301 = vmatpush3.msra.mxu1 %v156_v8 }
  0x31   :  { %302 = vmatprep.subr.mxu1 %v430_v0  ;;  %p407_p5 = pnand %p406_p4, %p400_p1 }
  0x32   :  { %303 = vmatpush3.msra.mxu1 %v155_v9 }
  0x33   :  { %304 = vmatprep.subr.mxu1 %v430_v0 }
  0x34   :  { %305 = vmatpush3.msra.mxu1 %v154_v10 }
  0x35   :  { %306 = vmatprep.subr.mxu1 %v430_v0 }
  0x36   :  { %307 = vmatpush3.msra.mxu1 %v153_v11 }
  0x37   :  { %308 = vmatprep.subr.mxu1 %v430_v0 }
  0x38   :  { %309 = vmatpush3.msra.mxu1 %v152_v12 }
  0x39   :  { %310 = vmatprep.subr.mxu1 %v430_v0 }
  0x3a   :  { %311 = vmatpush3.msra.mxu1 %v151_v13 }
  0x3b   :  { %312 = vmatprep.subr.mxu1 %v430_v0 }
  0x3c   :  { %313 = vmatpush3.msra.mxu1 %v150_v14 }
  0x3d   :  { %314 = vmatprep.subr.mxu1 %v430_v0 }
  0x3e   :  { %315 = vmatpush3.msra.mxu1 %v149_v15 }
  0x3f   :  { %316 = vmatprep.subr.mxu1 %v430_v0 }
  0x40   :  { %317 = vmatpush3.msra.mxu1 %v148_v16 }
  0x41   :  { %318 = vmatprep.subr.mxu1 %v430_v0 }
  0x42   :  { %319 = vmatpush3.msra.mxu1 %v147_v17 }
  0x43   :  { %320 = vmatprep.subr.mxu1 %v430_v0 }
  0x44   :  { %321 = vmatpush3.msra.mxu1 %v146_v18 }
  0x45   :  { %322 = vmatprep.subr.mxu1 %v430_v0 }
  0x46   :  { %323 = vmatpush3.msra.mxu1 %v145_v19 }
  0xeb   :  { %v140_v21 = vpop.f32.mrf.mxu0 }
  0xec   :  { %v141_v22 = vadd.f32 %v261_v20, %v140_v21 }
  0xed   :  { %v291_v23 = vpop.f32.mrf.mxu0 }
  0xee   :  { %v144_v24 = vmax.f32 %v141_v22, 0.0 }
  0xf0   :  { %325 = vmatmul.mubr.f32.vlgmr.msra.gmra.mxu1 %v144_v24 }
 0x1b0   :  { %v234_v26 = vpop.f32.mrf.mxu1 }
 0x1b1   :  { %v235_v27 = vadd.f32 %v263_v25, %v234_v26 }
 0x1b2   :  { %v326_v28 = vpop.f32.mrf.mxu1 }
 0x1b3   :  { %v264_v29 = vmul.f32 -1.442695, %v235_v27 }
 0x1b5   :  { %335 = vpow2.f32 %v264_v29 }
 0x1c2   :  { %v336_v30 = vpop.eup %335 }
 0x1c3   :  { %v241_v31 = vadd.f32 1.0, %v336_v30 }
 0x1c5   :  { %337 = vrcp.f32 %v241_v31 }
 0x1d2   :  { %v338_v32 = vpop.eup %337 }
 0x1d3   :  { %244 = vst [vmem:[#allocation8] sm:$0xff] %v338_v32 }
 0x1d4   :  { %410 = shalt.err (!%p407_p5)
}
 0x1d5   :  { %254 = dma.vmem_to_hbm [thread:$0]  %s252_s12, 128, %s486_s5, [#allocation4]  }
 0x1d6   :  { %423 = dma.done.wait [#allocation4], 128  }
 0x1d7   :  { %424 = vsyncadd [#allocation4], 4294967168 }
 0x1d8   :  { %258 = vsyncpa [#allocation3], 1 }
 0x1d9   :  { %259 = vsyncpa [#allocation6], 1 }
 0x1da   :  { %260 = vsyncpa [#allocation4], 1 }

</bundles_post_ra>
